<compile_context>
chip_gen: v7x
topology: tpu7x:2x2x1
jax: 0.10.0
libtpu: 0.0.40
codegen_flags: <defaults>
</compile_context>

<pallas_src>
import jax
import jax.numpy as jnp
import numpy as np
from jax import lax
from jax.experimental import pallas as pl
from jax.experimental.pallas import tpu as pltpu


def make_mha_cross_kernel(heads, S, D, compute_dtype):
    dk = D // heads
    use_approx_recip = (compute_dtype == jnp.bfloat16)

    def kernel(q_ref, k_ref, v_ref,
               wq_ref, bq_ref, wk_ref, bk_ref, wv_ref, bv_ref,
               o_ref, qh_ref):
        # grid = (B, HIST): b = program_id(0), group g = program_id(1) (innermost).
        g = pl.program_id(1)

        # Project Q once per batch (HIST axis is 'arbitrary'/innermost, so g == 0
        # is the first step for this batch on this core).  Cache the cast result
        # in VMEM scratch and reuse it for every HIST group.
        @pl.when(g == 0)
        def _():
            qp = jnp.dot(q_ref[0].astype(compute_dtype), wq_ref[...],
                         preferred_element_type=jnp.float32) + bq_ref[...]
            qh_ref[...] = qp.astype(compute_dtype)

        # Per-group K/V projection (f32 accumulation, compute_dtype operands).
        kg = (jnp.dot(k_ref[0, 0].astype(compute_dtype), wk_ref[...],
                      preferred_element_type=jnp.float32) + bk_ref[...]
              ).astype(compute_dtype)                          # (S, D)
        vg = (jnp.dot(v_ref[0, 0].astype(compute_dtype), wv_ref[...],
                      preferred_element_type=jnp.float32) + bv_ref[...]
              ).astype(compute_dtype)                          # (S, D)

        qh = qh_ref[...]                                       # (S, D) compute_dtype

        head_outs = []
        for h in range(heads):                                 # static, unrolled
            ql = qh[:, h * dk:(h + 1) * dk]                    # (S, dk) static lane slice
            kl = kg[:, h * dk:(h + 1) * dk]
            vl = vg[:, h * dk:(h + 1) * dk]

            # Contract over the last axis of BOTH operands -> no kl.T transpose.
            # NO 1/sqrt(dk) scaling (matches the PyTorch module).
            s = lax.dot_general(ql, kl, (((1,), (1,)), ((), ())),
                                preferred_element_type=jnp.float32)   # (S, S) f32

            # f32 softmax over this group's key axis (== softmax over the last
            # dim of the reference's (S, HIST, S) score tensor).
            m = jnp.max(s, axis=-1, keepdims=True)
            p = jnp.exp(s - m)
            denom = jnp.sum(p, axis=-1, keepdims=True)
            if use_approx_recip:
                attn = p * pl.reciprocal(denom, approx=True)   # EUP slot
            else:
                attn = p / denom                               # exact f32 path

            head_outs.append(
                jnp.dot(attn.astype(compute_dtype), vl,
                        preferred_element_type=jnp.float32))   # (S, dk) f32

        # Concatenate heads on the feature axis and store this group NOW:
        # one lane-dense (full-D) store per grid step.
        o_ref[0, 0] = jnp.concatenate(head_outs, axis=-1).astype(o_ref.dtype)

    return kernel


def multi_head_cross_attention(q, k, v, Wq, bq, Wk, bk, Wv, bv, heads,
                               compute_dtype=jnp.bfloat16):
    """q: (B,S,D), k/v: (B,HIST,S,D).  Linear applied as x @ W + b.
    Returns (B, HIST, S, D) in q.dtype (same layout as the PyTorch module)."""
    B, HIST, S, D = k.shape
    assert q.shape == (B, S, D)
    assert D % heads == 0
    out_dtype = q.dtype

    # Weights cast once in the wrapper (half-size DMA / residency when bf16).
    # Biases stay f32 (added after f32 accumulation).  Activations are cast
    # in-kernel right before the dots (avoids an extra HBM pass).
    Wqc, Wkc, Wvc = (w.astype(compute_dtype) for w in (Wq, Wk, Wv))
    bq2 = bq.reshape(1, D).astype(jnp.float32)
    bk2 = bk.reshape(1, D).astype(jnp.float32)
    bv2 = bv.reshape(1, D).astype(jnp.float32)

    kernel = make_mha_cross_kernel(heads, S, D, compute_dtype)

    # Explicit VMEM budget (re-derived for v7x: 64 MiB physical, 32 MiB default
    # scoped limit): double-buffered per-group blocks + grid-constant weights +
    # qh scratch + headroom for in-body f32 activations.
    in_b = np.dtype(q.dtype).itemsize
    cd_b = np.dtype(compute_dtype).itemsize
    out_b = np.dtype(out_dtype).itemsize
    blk = S * D
    est = (2 * blk * in_b                     # q block (double-buffered)
           + 2 * 2 * blk * in_b               # k, v blocks (double-buffered)
           + 2 * blk * out_b                  # out block (double-buffered)
           + 2 * (3 * D * D * cd_b + 3 * D * 4)   # resident weights + biases
           + blk * cd_b                       # qh scratch
           + 8 * blk * 4)                     # f32 activations headroom
    vmem_limit = int(min(max(2 * est, 32 << 20), 64 << 20))

    out = pl.pallas_call(
        kernel,
        out_shape=jax.ShapeDtypeStruct((B, HIST, S, D), out_dtype),
        grid=(B, HIST),
        in_specs=[
            pl.BlockSpec((1, S, D),      lambda b, g: (b, 0, 0)),     # q (HIST-constant)
            pl.BlockSpec((1, 1, S, D),   lambda b, g: (b, g, 0, 0)),  # k (one group)
            pl.BlockSpec((1, 1, S, D),   lambda b, g: (b, g, 0, 0)),  # v (one group)
            pl.BlockSpec((D, D),         lambda b, g: (0, 0)),        # Wq (grid-constant)
            pl.BlockSpec((1, D),         lambda b, g: (0, 0)),        # bq
            pl.BlockSpec((D, D),         lambda b, g: (0, 0)),        # Wk
            pl.BlockSpec((1, D),         lambda b, g: (0, 0)),        # bk
            pl.BlockSpec((D, D),         lambda b, g: (0, 0)),        # Wv
            pl.BlockSpec((1, D),         lambda b, g: (0, 0)),        # bv
        ],
        out_specs=pl.BlockSpec((1, 1, S, D), lambda b, g: (b, g, 0, 0)),
        scratch_shapes=[pltpu.VMEM((S, D), compute_dtype)],            # cached Q proj
        compiler_params=pltpu.CompilerParams(
            # HIST must be 'arbitrary' because the Q-projection scratch is
            # carried across the HIST steps of each batch (g==0 init pattern).
            dimension_semantics=("parallel", "arbitrary"),
            vmem_limit_bytes=vmem_limit),
    )(q, k, v, Wqc, bq2, Wkc, bk2, Wvc, bv2)

    return out   # already (B, HIST, S, D): no host-side transpose needed


def reference_forward(q, k, v, Wq, bq, Wk, bk, Wv, bv, heads):
    """Pure-JAX f32 transcription of the PyTorch forward (Linear == x @ W + b)."""
    B, HIST, S, D = k.shape
    dk = D // heads
    query = q @ Wq + bq                  # (B, S, D)
    key = k @ Wk + bk                    # (B, HIST, S, D)
    value = v @ Wv + bv                  # (B, HIST, S, D)

    qh = jnp.concatenate(jnp.split(query, heads, axis=-1), axis=0)   # (heads*B, S, dk)
    kh = jnp.concatenate(jnp.split(key,   heads, axis=-1), axis=0)   # (heads*B, HIST, S, dk)
    vh = jnp.concatenate(jnp.split(value, heads, axis=-1), axis=0)

    kh2 = kh.reshape(heads * B, HIST * S, dk).transpose(0, 2, 1)     # (heads*B, dk, HIST*S)
    scores = jnp.matmul(qh, kh2).reshape(heads * B, S, HIST, S)
    attn = jax.nn.softmax(scores, axis=-1)
    av = jnp.matmul(attn.transpose(0, 2, 1, 3), vh)                  # (heads*B, HIST, S, dk)
    out = jnp.concatenate(jnp.split(av, heads, axis=0), axis=-1)     # (B, HIST, S, D)
    return out


def reference_forward_matched(q, k, v, Wq, bq, Wk, bk, Wv, bv, heads, compute_dtype):
    """Pure-JAX reference mirroring the kernel's cast points (compute_dtype MXU
    operands, f32 accumulation, f32 softmax).  Validates the bf16 kernel path."""
    B, HIST, S, D = k.shape
    dk = D // heads
    cd, f32 = compute_dtype, jnp.float32
    qp = jnp.matmul(q.astype(cd), Wq.astype(cd), preferred_element_type=f32) + bq
    kp = jnp.matmul(k.astype(cd), Wk.astype(cd), preferred_element_type=f32) + bk
    vp = jnp.matmul(v.astype(cd), Wv.astype(cd), preferred_element_type=f32) + bv
    qhh = qp.reshape(B, S, heads, dk).transpose(0, 2, 1, 3).astype(cd)            # (B,h,S,dk)
    khh = kp.reshape(B, HIST, S, heads, dk).transpose(0, 3, 1, 2, 4).astype(cd)   # (B,h,G,S,dk)
    vhh = vp.reshape(B, HIST, S, heads, dk).transpose(0, 3, 1, 2, 4).astype(cd)
    s = jnp.einsum("bhqd,bhgkd->bhgqk", qhh, khh, preferred_element_type=f32)
    attn = jax.nn.softmax(s, axis=-1).astype(cd)
    o = jnp.einsum("bhgqk,bhgkd->bhgqd", attn, vhh, preferred_element_type=f32)
    return o.transpose(0, 2, 3, 1, 4).reshape(B, HIST, S, D)


if __name__ == "__main__":
    # Small shapes consistent with the module's forward.
    B, HIST, S, D, heads = 2, 3, 8, 32, 4

    key = jax.random.PRNGKey(0)
    kq, kk, kv, kwq, kbq, kwk, kbk, kwv, kbv = jax.random.split(key, 9)

    q = jax.random.normal(kq, (B, S, D), dtype=jnp.float32)
    k = jax.random.normal(kk, (B, HIST, S, D), dtype=jnp.float32)
    v = jax.random.normal(kv, (B, HIST, S, D), dtype=jnp.float32)

    scale = 1.0 / np.sqrt(D)
    Wq = jax.random.normal(kwq, (D, D), dtype=jnp.float32) * scale
    bq = jax.random.normal(kbq, (D,),   dtype=jnp.float32) * 0.1
    Wk = jax.random.normal(kwk, (D, D), dtype=jnp.float32) * scale
    bk = jax.random.normal(kbk, (D,),   dtype=jnp.float32) * 0.1
    Wv = jax.random.normal(kwv, (D, D), dtype=jnp.float32) * scale
    bv = jax.random.normal(kbv, (D,),   dtype=jnp.float32) * 0.1

    ref = jax.block_until_ready(
        reference_forward(q, k, v, Wq, bq, Wk, bk, Wv, bv, heads))

    # 1) Performance path: bf16 MXU operands, f32 accumulation/softmax.
    out_bf16 = jax.block_until_ready(
        multi_head_cross_attention(q, k, v, Wq, bq, Wk, bk, Wv, bv, heads,
                                   compute_dtype=jnp.bfloat16))
    assert out_bf16.shape == (B, HIST, S, D), out_bf16.shape
    matched = jax.block_until_ready(
        reference_forward_matched(q, k, v, Wq, bq, Wk, bk, Wv, bv, heads,
                                  jnp.bfloat16))
    np.testing.assert_allclose(np.asarray(out_bf16, np.float32),
                               np.asarray(matched, np.float32),
                               rtol=2e-2, atol=2e-2)

    # 2) Exact path: same kernel in f32 -> must match the spec reference tightly.
    out_f32 = jax.block_until_ready(
        multi_head_cross_attention(q, k, v, Wq, bq, Wk, bk, Wv, bv, heads,
                                   compute_dtype=jnp.float32))
    np.testing.assert_allclose(np.asarray(out_f32), np.asarray(ref),
                               rtol=1e-4, atol=1e-4)

    print("KERNEL_OK")
</pallas_src>

<mosaic_0001>
module attributes {stable_mosaic.version = 11 : i64} {
  func.func @kernel(%arg0: i32, %arg1: i32, %arg2: memref<1x8x32xf32, #tpu.memory_space<vmem>>, %arg3: memref<1x1x8x32xf32, #tpu.memory_space<vmem>>, %arg4: memref<1x1x8x32xf32, #tpu.memory_space<vmem>>, %arg5: memref<32x32xbf16, #tpu.memory_space<vmem>>, %arg6: memref<1x32xf32, #tpu.memory_space<vmem>>, %arg7: memref<32x32xbf16, #tpu.memory_space<vmem>>, %arg8: memref<1x32xf32, #tpu.memory_space<vmem>>, %arg9: memref<32x32xbf16, #tpu.memory_space<vmem>>, %arg10: memref<1x32xf32, #tpu.memory_space<vmem>>, %arg11: memref<1x1x8x32xf32, #tpu.memory_space<vmem>>, %arg12: memref<8x32xbf16, #tpu.memory_space<vmem>>) attributes {dimension_semantics = [#tpu.dimension_semantics<parallel>, #tpu.dimension_semantics<arbitrary>], iteration_bounds = array<i64: 2, 3>, scalar_prefetch = 0 : i64, scratch_operands = 1 : i64, tpu.core_type = #tpu.core_type<tc>, window_params = [{transform_indices = @transform_0, window_bounds = array<i64: 1, 8, 32>}, {transform_indices = @transform_1, window_bounds = array<i64: 1, 1, 8, 32>}, {transform_indices = @transform_2, window_bounds = array<i64: 1, 1, 8, 32>}, {pipeline_mode = #tpu.pipeline_mode<synchronous>, transform_indices = @transform_3, window_bounds = array<i64: 32, 32>}, {pipeline_mode = #tpu.pipeline_mode<synchronous>, transform_indices = @transform_4, window_bounds = array<i64: 1, 32>}, {pipeline_mode = #tpu.pipeline_mode<synchronous>, transform_indices = @transform_5, window_bounds = array<i64: 32, 32>}, {pipeline_mode = #tpu.pipeline_mode<synchronous>, transform_indices = @transform_6, window_bounds = array<i64: 1, 32>}, {pipeline_mode = #tpu.pipeline_mode<synchronous>, transform_indices = @transform_7, window_bounds = array<i64: 32, 32>}, {pipeline_mode = #tpu.pipeline_mode<synchronous>, transform_indices = @transform_8, window_bounds = array<i64: 1, 32>}, {transform_indices = @transform_9, window_bounds = array<i64: 1, 1, 8, 32>}]} {
    %c0_i32 = arith.constant 0 : i32
    %0 = arith.cmpi eq, %arg1, %c0_i32 : i32
    %1 = arith.extui %0 : i1 to i32
    %c0_i32_0 = arith.constant 0 : i32
    %2 = arith.cmpi ne, %1, %c0_i32_0 : i32
    scf.if %2 {
      %c0_39 = arith.constant 0 : index
      %c0_40 = arith.constant 0 : index
      %c0_41 = arith.constant 0 : index
      %90 = vector.load %arg2[%c0_39, %c0_40, %c0_41] : memref<1x8x32xf32, #tpu.memory_space<vmem>>, vector<1x8x32xf32>
      %91 = vector.shape_cast %90 : vector<1x8x32xf32> to vector<8x32xf32>
      %92 = arith.truncf %91 : vector<8x32xf32> to vector<8x32xbf16>
      %c0_42 = arith.constant 0 : index
      %c0_43 = arith.constant 0 : index
      %93 = vector.load %arg5[%c0_42, %c0_43] : memref<32x32xbf16, #tpu.memory_space<vmem>>, vector<32x32xbf16>
      %cst_44 = arith.constant dense<0.000000e+00> : vector<8x32xf32>
      %94 = tpu.matmul %92, %93, %cst_44 {dimension_numbers = #tpu.dot_dimension_numbers<[1], [0], [0], [1], [0, 0, 1, 1], [], []>} : vector<8x32xbf16>, vector<32x32xbf16>, vector<8x32xf32> -> vector<8x32xf32>
      %c0_45 = arith.constant 0 : index
      %c0_46 = arith.constant 0 : index
      %95 = vector.load %arg6[%c0_45, %c0_46] : memref<1x32xf32, #tpu.memory_space<vmem>>, vector<1x32xf32>
      %96 = vector.broadcast %95 : vector<1x32xf32> to vector<8x32xf32>
      %97 = arith.addf %94, %96 : vector<8x32xf32>
      %98 = arith.truncf %97 : vector<8x32xf32> to vector<8x32xbf16>
      %c0_47 = arith.constant 0 : index
      %c0_48 = arith.constant 0 : index
      %99 = vector.load %arg12[%c0_47, %c0_48] : memref<8x32xbf16, #tpu.memory_space<vmem>>, vector<8x32xbf16>
      tpu.vector_store %arg12[%c0_47, %c0_48], %98 {strides = array<i32>} : memref<8x32xbf16, #tpu.memory_space<vmem>>, vector<8x32xbf16>,
    } else {
    }
    %c0 = arith.constant 0 : index
    %c0_1 = arith.constant 0 : index
    %c0_2 = arith.constant 0 : index
    %c0_3 = arith.constant 0 : index
    %3 = vector.load %arg3[%c0, %c0_1, %c0_2, %c0_3] : memref<1x1x8x32xf32, #tpu.memory_space<vmem>>, vector<1x1x8x32xf32>
    %4 = vector.shape_cast %3 : vector<1x1x8x32xf32> to vector<8x32xf32>
    %5 = arith.truncf %4 : vector<8x32xf32> to vector<8x32xbf16>
    %c0_4 = arith.constant 0 : index
    %c0_5 = arith.constant 0 : index
    %6 = vector.load %arg7[%c0_4, %c0_5] : memref<32x32xbf16, #tpu.memory_space<vmem>>, vector<32x32xbf16>
    %cst = arith.constant dense<0.000000e+00> : vector<8x32xf32>
    %7 = tpu.matmul %5, %6, %cst {dimension_numbers = #tpu.dot_dimension_numbers<[1], [0], [0], [1], [0, 0, 1, 1], [], []>} : vector<8x32xbf16>, vector<32x32xbf16>, vector<8x32xf32> -> vector<8x32xf32>
    %c0_6 = arith.constant 0 : index
    %c0_7 = arith.constant 0 : index
    %8 = vector.load %arg8[%c0_6, %c0_7] : memref<1x32xf32, #tpu.memory_space<vmem>>, vector<1x32xf32>
    %9 = vector.broadcast %8 : vector<1x32xf32> to vector<8x32xf32>
    %10 = arith.addf %7, %9 : vector<8x32xf32>
    %11 = arith.truncf %10 : vector<8x32xf32> to vector<8x32xbf16>
    %c0_8 = arith.constant 0 : index
    %c0_9 = arith.constant 0 : index
    %c0_10 = arith.constant 0 : index
    %c0_11 = arith.constant 0 : index
    %12 = vector.load %arg4[%c0_8, %c0_9, %c0_10, %c0_11] : memref<1x1x8x32xf32, #tpu.memory_space<vmem>>, vector<1x1x8x32xf32>
    %13 = vector.shape_cast %12 : vector<1x1x8x32xf32> to vector<8x32xf32>
    %14 = arith.truncf %13 : vector<8x32xf32> to vector<8x32xbf16>
    %c0_12 = arith.constant 0 : index
    %c0_13 = arith.constant 0 : index
    %15 = vector.load %arg9[%c0_12, %c0_13] : memref<32x32xbf16, #tpu.memory_space<vmem>>, vector<32x32xbf16>
    %cst_14 = arith.constant dense<0.000000e+00> : vector<8x32xf32>
    %16 = tpu.matmul %14, %15, %cst_14 {dimension_numbers = #tpu.dot_dimension_numbers<[1], [0], [0], [1], [0, 0, 1, 1], [], []>} : vector<8x32xbf16>, vector<32x32xbf16>, vector<8x32xf32> -> vector<8x32xf32>
    %c0_15 = arith.constant 0 : index
    %c0_16 = arith.constant 0 : index
    %17 = vector.load %arg10[%c0_15, %c0_16] : memref<1x32xf32, #tpu.memory_space<vmem>>, vector<1x32xf32>
    %18 = vector.broadcast %17 : vector<1x32xf32> to vector<8x32xf32>
    %19 = arith.addf %16, %18 : vector<8x32xf32>
    %20 = arith.truncf %19 : vector<8x32xf32> to vector<8x32xbf16>
    %c0_17 = arith.constant 0 : index
    %c0_18 = arith.constant 0 : index
    %21 = vector.load %arg12[%c0_17, %c0_18] : memref<8x32xbf16, #tpu.memory_space<vmem>>, vector<8x32xbf16>
    %22 = vector.extract_strided_slice %21 {offsets = [0, 0], sizes = [8, 8], strides = [1, 1]} : vector<8x32xbf16> to vector<8x8xbf16>
    %23 = vector.extract_strided_slice %11 {offsets = [0, 0], sizes = [8, 8], strides = [1, 1]} : vector<8x32xbf16> to vector<8x8xbf16>
    %24 = vector.extract_strided_slice %20 {offsets = [0, 0], sizes = [8, 8], strides = [1, 1]} : vector<8x32xbf16> to vector<8x8xbf16>
    %cst_19 = arith.constant dense<0.000000e+00> : vector<8x8xf32>
    %25 = tpu.matmul %22, %23, %cst_19 {dimension_numbers = #tpu.dot_dimension_numbers<[1], [1], [0], [0], [0, 0, 1, 0], [], []>} : vector<8x8xbf16>, vector<8x8xbf16>, vector<8x8xf32> -> vector<8x8xf32>
    %cst_20 = arith.constant dense<0xFF800000> : vector<8xf32>
    %26 = vector.multi_reduction <maximumf>, %25, %cst_20 [1] : vector<8x8xf32> to vector<8xf32>
    %27 = vector.shape_cast %26 : vector<8xf32> to vector<8x1xf32>
    %28 = vector.broadcast %27 : vector<8x1xf32> to vector<8x8xf32>
    %29 = arith.subf %25, %28 : vector<8x8xf32>
    %30 = math.exp %29 : vector<8x8xf32>
    %cst_21 = arith.constant dense<0.000000e+00> : vector<8xf32>
    %31 = vector.multi_reduction <add>, %30, %cst_21 [1] : vector<8x8xf32> to vector<8xf32>
    %32 = vector.shape_cast %31 : vector<8xf32> to vector<8x1xf32>
    %33 = tpu.reciprocal %32 {approx = true} : vector<8x1xf32> -> vector<8x1xf32>
    %34 = vector.broadcast %33 : vector<8x1xf32> to vector<8x8xf32>
    %35 = arith.mulf %30, %34 : vector<8x8xf32>
    %36 = arith.truncf %35 : vector<8x8xf32> to vector<8x8xbf16>
    %cst_22 = arith.constant dense<0.000000e+00> : vector<8x8xf32>
    %37 = tpu.matmul %36, %24, %cst_22 {dimension_numbers = #tpu.dot_dimension_numbers<[1], [0], [0], [1], [0, 0, 1, 1], [], []>} : vector<8x8xbf16>, vector<8x8xbf16>, vector<8x8xf32> -> vector<8x8xf32>
    %38 = vector.extract_strided_slice %21 {offsets = [0, 8], sizes = [8, 8], strides = [1, 1]} : vector<8x32xbf16> to vector<8x8xbf16>
    %39 = vector.extract_strided_slice %11 {offsets = [0, 8], sizes = [8, 8], strides = [1, 1]} : vector<8x32xbf16> to vector<8x8xbf16>
    %40 = vector.extract_strided_slice %20 {offsets = [0, 8], sizes = [8, 8], strides = [1, 1]} : vector<8x32xbf16> to vector<8x8xbf16>
    %cst_23 = arith.constant dense<0.000000e+00> : vector<8x8xf32>
    %41 = tpu.matmul %38, %39, %cst_23 {dimension_numbers = #tpu.dot_dimension_numbers<[1], [1], [0], [0], [0, 0, 1, 0], [], []>} : vector<8x8xbf16>, vector<8x8xbf16>, vector<8x8xf32> -> vector<8x8xf32>
    %cst_24 = arith.constant dense<0xFF800000> : vector<8xf32>
    %42 = vector.multi_reduction <maximumf>, %41, %cst_24 [1] : vector<8x8xf32> to vector<8xf32>
    %43 = vector.shape_cast %42 : vector<8xf32> to vector<8x1xf32>
    %44 = vector.broadcast %43 : vector<8x1xf32> to vector<8x8xf32>
    %45 = arith.subf %41, %44 : vector<8x8xf32>
    %46 = math.exp %45 : vector<8x8xf32>
    %cst_25 = arith.constant dense<0.000000e+00> : vector<8xf32>
    %47 = vector.multi_reduction <add>, %46, %cst_25 [1] : vector<8x8xf32> to vector<8xf32>
    %48 = vector.shape_cast %47 : vector<8xf32> to vector<8x1xf32>
    %49 = tpu.reciprocal %48 {approx = true} : vector<8x1xf32> -> vector<8x1xf32>
    %50 = vector.broadcast %49 : vector<8x1xf32> to vector<8x8xf32>
    %51 = arith.mulf %46, %50 : vector<8x8xf32>
    %52 = arith.truncf %51 : vector<8x8xf32> to vector<8x8xbf16>
    %cst_26 = arith.constant dense<0.000000e+00> : vector<8x8xf32>
    %53 = tpu.matmul %52, %40, %cst_26 {dimension_numbers = #tpu.dot_dimension_numbers<[1], [0], [0], [1], [0, 0, 1, 1], [], []>} : vector<8x8xbf16>, vector<8x8xbf16>, vector<8x8xf32> -> vector<8x8xf32>
    %54 = vector.extract_strided_slice %21 {offsets = [0, 16], sizes = [8, 8], strides = [1, 1]} : vector<8x32xbf16> to vector<8x8xbf16>
    %55 = vector.extract_strided_slice %11 {offsets = [0, 16], sizes = [8, 8], strides = [1, 1]} : vector<8x32xbf16> to vector<8x8xbf16>
    %56 = vector.extract_strided_slice %20 {offsets = [0, 16], sizes = [8, 8], strides = [1, 1]} : vector<8x32xbf16> to vector<8x8xbf16>
    %cst_27 = arith.constant dense<0.000000e+00> : vector<8x8xf32>
    %57 = tpu.matmul %54, %55, %cst_27 {dimension_numbers = #tpu.dot_dimension_numbers<[1], [1], [0], [0], [0, 0, 1, 0], [], []>} : vector<8x8xbf16>, vector<8x8xbf16>, vector<8x8xf32> -> vector<8x8xf32>
    %cst_28 = arith.constant dense<0xFF800000> : vector<8xf32>
    %58 = vector.multi_reduction <maximumf>, %57, %cst_28 [1] : vector<8x8xf32> to vector<8xf32>
    %59 = vector.shape_cast %58 : vector<8xf32> to vector<8x1xf32>
    %60 = vector.broadcast %59 : vector<8x1xf32> to vector<8x8xf32>
    %61 = arith.subf %57, %60 : vector<8x8xf32>
    %62 = math.exp %61 : vector<8x8xf32>
    %cst_29 = arith.constant dense<0.000000e+00> : vector<8xf32>
    %63 = vector.multi_reduction <add>, %62, %cst_29 [1] : vector<8x8xf32> to vector<8xf32>
    %64 = vector.shape_cast %63 : vector<8xf32> to vector<8x1xf32>
    %65 = tpu.reciprocal %64 {approx = true} : vector<8x1xf32> -> vector<8x1xf32>
    %66 = vector.broadcast %65 : vector<8x1xf32> to vector<8x8xf32>
    %67 = arith.mulf %62, %66 : vector<8x8xf32>
    %68 = arith.truncf %67 : vector<8x8xf32> to vector<8x8xbf16>
    %cst_30 = arith.constant dense<0.000000e+00> : vector<8x8xf32>
    %69 = tpu.matmul %68, %56, %cst_30 {dimension_numbers = #tpu.dot_dimension_numbers<[1], [0], [0], [1], [0, 0, 1, 1], [], []>} : vector<8x8xbf16>, vector<8x8xbf16>, vector<8x8xf32> -> vector<8x8xf32>
    %70 = vector.extract_strided_slice %21 {offsets = [0, 24], sizes = [8, 8], strides = [1, 1]} : vector<8x32xbf16> to vector<8x8xbf16>
    %71 = vector.extract_strided_slice %11 {offsets = [0, 24], sizes = [8, 8], strides = [1, 1]} : vector<8x32xbf16> to vector<8x8xbf16>
    %72 = vector.extract_strided_slice %20 {offsets = [0, 24], sizes = [8, 8], strides = [1, 1]} : vector<8x32xbf16> to vector<8x8xbf16>
    %cst_31 = arith.constant dense<0.000000e+00> : vector<8x8xf32>
    %73 = tpu.matmul %70, %71, %cst_31 {dimension_numbers = #tpu.dot_dimension_numbers<[1], [1], [0], [0], [0, 0, 1, 0], [], []>} : vector<8x8xbf16>, vector<8x8xbf16>, vector<8x8xf32> -> vector<8x8xf32>
    %cst_32 = arith.constant dense<0xFF800000> : vector<8xf32>
    %74 = vector.multi_reduction <maximumf>, %73, %cst_32 [1] : vector<8x8xf32> to vector<8xf32>
    %75 = vector.shape_cast %74 : vector<8xf32> to vector<8x1xf32>
    %76 = vector.broadcast %75 : vector<8x1xf32> to vector<8x8xf32>
    %77 = arith.subf %73, %76 : vector<8x8xf32>
    %78 = math.exp %77 : vector<8x8xf32>
    %cst_33 = arith.constant dense<0.000000e+00> : vector<8xf32>
    %79 = vector.multi_reduction <add>, %78, %cst_33 [1] : vector<8x8xf32> to vector<8xf32>
    %80 = vector.shape_cast %79 : vector<8xf32> to vector<8x1xf32>
    %81 = tpu.reciprocal %80 {approx = true} : vector<8x1xf32> -> vector<8x1xf32>
    %82 = vector.broadcast %81 : vector<8x1xf32> to vector<8x8xf32>
    %83 = arith.mulf %78, %82 : vector<8x8xf32>
    %84 = arith.truncf %83 : vector<8x8xf32> to vector<8x8xbf16>
    %cst_34 = arith.constant dense<0.000000e+00> : vector<8x8xf32>
    %85 = tpu.matmul %84, %72, %cst_34 {dimension_numbers = #tpu.dot_dimension_numbers<[1], [0], [0], [1], [0, 0, 1, 1], [], []>} : vector<8x8xbf16>, vector<8x8xbf16>, vector<8x8xf32> -> vector<8x8xf32>
    %86 = tpu.concatenate %37, %53, %69, %85 in 1 : vector<8x8xf32>, vector<8x8xf32>, vector<8x8xf32>, vector<8x8xf32> -> vector<8x32xf32>
    %c0_35 = arith.constant 0 : index
    %c0_36 = arith.constant 0 : index
    %c0_37 = arith.constant 0 : index
    %c0_38 = arith.constant 0 : index
    %87 = vector.load %arg11[%c0_35, %c0_36, %c0_37, %c0_38] : memref<1x1x8x32xf32, #tpu.memory_space<vmem>>, vector<1x1x8x32xf32>
    %88 = vector.shape_cast %87 : vector<1x1x8x32xf32> to vector<8x32xf32>
    %89 = vector.shape_cast %86 : vector<8x32xf32> to vector<1x1x8x32xf32>
    tpu.vector_store %arg11[%c0_35, %c0_36, %c0_37, %c0_38], %89 {strides = array<i32>} : memref<1x1x8x32xf32, #tpu.memory_space<vmem>>, vector<1x1x8x32xf32>,
    return
  }
  func.func @transform_0(%arg0: i32, %arg1: i32) -> (i32, i32, i32) {
    %c0_i32 = arith.constant 0 : i32
    %c0_i32_0 = arith.constant 0 : i32
    %c0_i32_1 = arith.constant 0 : i32
    return %arg0, %c0_i32, %c0_i32_0 : i32, i32, i32
  }
  func.func @transform_1(%arg0: i32, %arg1: i32) -> (i32, i32, i32, i32) {
    %c0_i32 = arith.constant 0 : i32
    %c0_i32_0 = arith.constant 0 : i32
    %c0_i32_1 = arith.constant 0 : i32
    return %arg0, %arg1, %c0_i32, %c0_i32_0 : i32, i32, i32, i32
  }
  func.func @transform_2(%arg0: i32, %arg1: i32) -> (i32, i32, i32, i32) {
    %c0_i32 = arith.constant 0 : i32
    %c0_i32_0 = arith.constant 0 : i32
    %c0_i32_1 = arith.constant 0 : i32
    return %arg0, %arg1, %c0_i32, %c0_i32_0 : i32, i32, i32, i32
  }
  func.func @transform_3(%arg0: i32, %arg1: i32) -> (i32, i32) {
    %c0_i32 = arith.constant 0 : i32
    %c0_i32_0 = arith.constant 0 : i32
    %c0_i32_1 = arith.constant 0 : i32
    return %c0_i32, %c0_i32_0 : i32, i32
  }
  func.func @transform_4(%arg0: i32, %arg1: i32) -> (i32, i32) {
    %c0_i32 = arith.constant 0 : i32
    %c0_i32_0 = arith.constant 0 : i32
    %c0_i32_1 = arith.constant 0 : i32
    return %c0_i32, %c0_i32_0 : i32, i32
  }
  func.func @transform_5(%arg0: i32, %arg1: i32) -> (i32, i32) {
    %c0_i32 = arith.constant 0 : i32
    %c0_i32_0 = arith.constant 0 : i32
    %c0_i32_1 = arith.constant 0 : i32
    return %c0_i32, %c0_i32_0 : i32, i32
  }
  func.func @transform_6(%arg0: i32, %arg1: i32) -> (i32, i32) {
    %c0_i32 = arith.constant 0 : i32
    %c0_i32_0 = arith.constant 0 : i32
    %c0_i32_1 = arith.constant 0 : i32
    return %c0_i32, %c0_i32_0 : i32, i32
  }
  func.func @transform_7(%arg0: i32, %arg1: i32) -> (i32, i32) {
    %c0_i32 = arith.constant 0 : i32
    %c0_i32_0 = arith.constant 0 : i32
    %c0_i32_1 = arith.constant 0 : i32
    return %c0_i32, %c0_i32_0 : i32, i32
  }
  func.func @transform_8(%arg0: i32, %arg1: i32) -> (i32, i32) {
    %c0_i32 = arith.constant 0 : i32
    %c0_i32_0 = arith.constant 0 : i32
    %c0_i32_1 = arith.constant 0 : i32
    return %c0_i32, %c0_i32_0 : i32, i32
  }
  func.func @transform_9(%arg0: i32, %arg1: i32) -> (i32, i32, i32, i32) {
    %c0_i32 = arith.constant 0 : i32
    %c0_i32_0 = arith.constant 0 : i32
    %c0_i32_1 = arith.constant 0 : i32
    return %arg0, %arg1, %c0_i32, %c0_i32_0 : i32, i32, i32, i32
  }
}

</mosaic_0001>

<bundles_post_ra>
// kernel: tpu_custom_call.1
= control target key start
LH: loop header
LB: loop body
LE: loop exit
PB: predicated region body
PF: predicated region fallthrough
CT: control target
= control target key end

     0   :  { %s2468_s0 = inlined_call_operand.hbm [shape: f32[2,8,32], index: 0, kind: input, shape index: {}]   ;;  %s2469_s1 = inlined_call_operand.hbm [shape: f32[2,3,8,32], index: 1, kind: input, shape index: {}]   ;;  %s2470_s2 = inlined_call_operand.hbm [shape: f32[2,3,8,32], index: 2, kind: input, shape index: {}]   ;;  %s2471_s3 = inlined_call_operand.hbm [shape: bf16[32,32], index: 3, kind: input, shape index: {}]   ;;  %s2472_s4 = inlined_call_operand.vmem [shape: f32[1,32], index: 4, kind: input, shape index: {}]   ;;  %s2473_s5 = inlined_call_operand.vmem [shape: bf16[32,32], index: 5, kind: input, shape index: {}]   ;;  %s2474_s6 = inlined_call_operand.vmem [shape: f32[1,32], index: 6, kind: input, shape index: {}]   ;;  %s2475_s7 = inlined_call_operand.hbm [shape: bf16[32,32], index: 7, kind: input, shape index: {}]   ;;  %s2476_s8 = inlined_call_operand.vmem [shape: f32[1,32], index: 8, kind: input, shape index: {}]   ;;  %s2477_s9 = inlined_call_operand.hbm [shape: f32[2,3,8,32], index: 9, kind: output, shape index: {}]  }
   0x1   :  { %2502 = sst [smem:[#allocation27_spill]] %s2469_s1 }
   0x2   :  { %2503 = sst [smem:[#allocation28_spill]] %s2471_s3 }
   0x3   :  { %2504 = sst [smem:[#allocation29_spill]] %s2472_s4 }
   0x4   :  { %2505 = sst [smem:[#allocation30_spill]] %s2473_s5 }
   0x5   :  { %2506 = sst [smem:[#allocation31_spill]] %s2474_s6 }
   0x6   :  { %2507 = sst [smem:[#allocation32_spill]] %s2476_s8 }
   0x7   :  { %2508 = sst [smem:[#allocation33_spill]] %s2477_s9 }
   0x8   :  { %14 = vsyncpa [#allocation4], 0 }
   0x9   :  { %16 = vsyncpa [#allocation4 + $0x1], 0 }
   0xa   :  { %17 = vsyncpa [#allocation7], 0 }
   0xb   :  { %19 = vsyncpa [#allocation7 + $0x1], 0 }
   0xc   :  { %20 = vsyncpa [#allocation10], 0 }
   0xd   :  { %21 = vsyncpa [#allocation5], 0 }
   0xe   :  { %23 = vsyncpa [#allocation5 + $0x1], 0  ;;  %s1970_s30 = smov 0   ;;  %s1972_s10 = smov 0  }
   0xf   :  { %s1974_s11 = smov 0   ;;  %s1976_s12 = smov 0  }
  0x10   :  { %s1978_s13 = smov 0   ;;  %s1980_s14 = smov 0  }
  0x11   :  { %s1982_s15 = smov 0   ;;  %s1984_s16 = smov 0  }
  0x12   :  { %s1986_s17 = smov 0   ;;  %s1988_s18 = smov 0  }
  0x13   :  { %s1990_s19 = smov 0  }
  0x14 LB: > { %2509 = sst [smem:[#allocation17_spill]] %s1860_s30  ;;  %s2026_s20 = sadd.s32 4294967295, %s1900_s19   ;;  %s1900_s19 = sphi %s1990_s19, %s29_s19   ;;  %s1896_s18 = sphi %s1988_s18, %s2575_s18   ;;  %s1892_s17 = sphi %s1986_s17, %s2567_s17   ;;  %s1888_s16 = sphi %s1984_s16, %s2574_s16   ;;  %s1884_s15 = sphi %s1982_s15, %s2566_s15   ;;  %s1880_s14 = sphi %s1980_s14, %s2573_s14   ;;  %s1876_s13 = sphi %s1978_s13, %s2572_s13   ;;  %s1872_s12 = sphi %s1976_s12, %s2571_s12   ;;  %s1868_s11 = sphi %s1974_s11, %s2564_s11   ;;  %s1864_s10 = sphi %s1972_s10, %s2570_s10   ;;  %s1860_s30 = sphi %s1970_s30, %s2569_s30  }
  0x15   : > { %2510 = sst [smem:[#allocation18_spill]] %s1868_s11  ;;  %p1313_p0 = scmp.ge.s32.totalorder %s1900_s19, 1 }
  0x16   : > { %2511 = sst [smem:[#allocation19_spill]] %s1884_s15  ;;  %p2479_p1 = scmp.eq.s32.totalorder %s2026_s20, 0 }
  0x17   : > { %2512 = sst [smem:[#allocation20_spill]] %s1888_s16  ;;  %p282_p2 = scmp.lt.s32.totalorder %s1900_s19, 7 }
  0x18   : > { %2513 = sst [smem:[#allocation21_spill]] %s1892_s17  ;;  %s1902_s22 = smov [#allocation9]  }
  0x19   : > { %p2031_p3 = pnand %p1313_p0, %p282_p2  ;;  %s294_s23 = sshll.u32 %s1902_s22, 4  ;;  %s295_s23 = int_to_ptr.vmem [resolvable:$true] %s294_s23 }
  0x1a   : > { %s2516_s3 = sld [smem:[#allocation28_spill]] }
  0x1b   : > { %s2514_s21 = scalar_select %p2031_p3, 1, 0 }
  0x1c   : > { %p1472_p4 = pneg %p2031_p3 }
  0x1e   : > { %p2039_p5 = pnand %p1472_p4, %p2479_p1 }
  0x20   : > { %s1624_s27 = scalar_lea.hbm %s2516_s3, 256  ;;  %p2493_p7 = pneg %p2039_p5 }
  0x21   : > { %p1625_p6 = scmp.ne.s32.totalorder %s2516_s3, %s1624_s27  ;;  %p1631_p10 = scmp.lt.u32.totalorder %s1624_s27, %s2516_s3 }
  0x23   : > { %p1627_p8 = pnand %p2493_p7, %p1625_p6 }
  0x25   : > { %p1628_p9 = pneg %p1627_p8 }
  0x27   : > { %p1633_p11 = pnand %p1631_p10, %p1628_p9 }
  0x29   : > { %1636 = shalt.err (!%p1633_p11)
}
  0x2a   : > { %s1637_s25 = scalar_lea.vmem %s295_s23, 256  ;;  %p1645_p2 = scmp.lt.s32.totalorder %s295_s23, %s295_s23 }
  0x2b   : > { %p1638_p12 = scmp.ne.s32.totalorder %s295_s23, %s1637_s25  ;;  %p1646_p4 = scmp.lt.s32.totalorder %s1637_s25, %s1637_s25 }
  0x2d   : > { %p1640_p13 = pnand %p1638_p12, %p2493_p7  ;;  %p1647_p1 = por %p1646_p4, %p1645_p2 }
  0x2f   : > { %p1641_p0 = pneg %p1640_p13 }
  0x31   : > { %p1648_p3 = pnand %p1647_p1, %p1641_p0 }
  0x33   : > { %1651 = shalt.err (!%p1648_p3)
}
  0x34   : > { %s2481_s26 = smov 64   ;;  %s2482_s9 = smov 4  }
  0x35   : > { %1475 = dma.hbm_to_vmem [thread:$0]  (!%p2039_p5), %s2516_s3, 256, %s295_s23, [#allocation10], %s2481_s26, %s2481_s26, %s2482_s9  }
  0x36   : > { %s1312_s29 = sadd.s32 4294967294, %s1900_s19   ;;  %s38_s22 = sadd.s32 1, %s1892_s17 }
  0x37   : > { %s41_s25 = sadd.s32 1, %s1896_s18  ;;  %p39_p1 = scmp.ge.s32.totalorder %s38_s22, 3 }
  0x38   : > { %p2492_p3 = scmp.eq.s32.totalorder %s1900_s19, 0  ;;  %s76_s16 = sadd.s32 1, %s1868_s11 }
  0x39   : > { %p83_p6 = scmp.ne.s32.totalorder %s1868_s11, %s1864_s10  ;;  %s2577_s22 = smov (%p39_p1, %s38_s22), 0 }
  0x3a   : > { %2517 = sst [smem:[#allocation22_spill]] %s2577_s22  ;;  %s2579_s25 = smov (!%p39_p1, %s41_s25), %s1896_s18 }
  0x3b   : > { %s72_s8 = ssub.s32 %s1892_s17, %s2577_s22  ;;  %p2082_p8 = por %p83_p6, %p2492_p3 }
  0x3c   : > { %p43_p9 = scmp.ge.s32.totalorder %s2579_s25, 2  ;;  %p89_p10 = scmp.ne.s32.totalorder %s1864_s10, %s1860_s30 }
  0x3d   : > { %p269_p11 = scmp.eq.s32.totalorder %s2026_s20, 5  ;;  %p275_p12 = scmp.eq.s32.totalorder %s1312_s29, 5 }
  0x3e   : > { %s2581_s25 = smov (%p43_p9, %s2579_s25), 0  ;;  %p2520_p13 = scmp.eq.s32.totalorder %s2026_s20, 0 }
  0x3f   : > { %2519 = sst [smem:[#allocation23_spill]] %s2581_s25  ;;  %p2097_p2 = por %p269_p11, %p83_p6 }
  0x40   : > { %p2093_p0 = por %p89_p10, %p2520_p13  ;;  %s2103_s26 = ssub.s32 %s1896_s18, %s2581_s25 }
  0x41   : > { %s2522_s28 = scalar_select %p2097_p2, 1, 0 }
  0x42   : > { %s2521_s27 = scalar_select %p2093_p0, 1, 0 }
  0x43   : > { %2523 = sst [smem:[#allocation24_spill]] %s2522_s28  ;;  %p2105_p4 = por %p275_p12, %p89_p10 }
  0x44   : > { %s73_s9 = sor.u32 %s72_s8, %s2103_s26  ;;  %p2491_p13 = scmp.lt.s32.totalorder %s1900_s19, 6 }
  0x45   : > { %s2524_s29 = scalar_select %p2105_p4, 1, 0 }
  0x46   : > { %p74_p9 = scmp.eq.s32.totalorder %s73_s9, 0  ;;  %s351_s3 = sand.u32 1, %s1900_s19  }
  0x47   : > { %2525 = sst [smem:[#allocation25_spill]] %s2524_s29  ;;  %s353_s22 = sand.u32 1, %s1868_s11  }
  0x48   : > { %s2115_s30 = scalar_select %p74_p9, %s1868_s11, %s76_s16  }
  0x49   : > { %s2117_s6 = sshll.u32 %s353_s22, 3  ;;  %s1453_s28 = smul.u32 3, %s1896_s18 }
  0x4a   : > { %2526 = sst [smem:[#allocation26_spill]] %s2115_s30  ;;  %s355_s25 = scalar_lea.vmem [#allocation6], %s2117_s6 }
  0x4b   : > { %s364_s5 = sshll.u32 %s355_s25, 4  ;;  %p2125_p6 = pnand %p2491_p13, %p2082_p8  ;;  %s2132_s5 = int_to_ptr.vmem [resolvable:$true] %s364_s5 }
  0x4c   : > { %s2130_s8 = sadd.s32 %s1892_s17, %s1453_s28  ;;  %s2528_s1 = sld [smem:[#allocation27_spill]] }
  0x4d   : > { %s2527_s4 = scalar_select %p2125_p6, 1, 0 }
  0x4e   : > { %s2490_s16 = sshll.u32 %s2130_s8, 7  ;;  %s2142_s23 = scalar_lea.sflag [#allocation7], %s351_s3 }
  0x4f   : > { %p2498_p10 = pneg %p2125_p6 }
  0x52   : > { %s2140_s25 = scalar_lea.hbm %s2528_s1, %s2490_s16  ;;  %s1657_s9 = scalar_lea.hbm %s2528_s1, 768 }
  0x53   : > { %s1652_s30 = scalar_lea.hbm %s2140_s25, 128  ;;  %p1658_p9 = scmp.lt.u32.totalorder %s2140_s25, %s2528_s1 }
  0x54   : > { %p1653_p8 = scmp.ne.s32.totalorder %s2140_s25, %s1652_s30  ;;  %p1659_p13 = scmp.lt.u32.totalorder %s1657_s9, %s1652_s30 }
  0x55   : > { %p1661_p1 = scmp.lt.u32.totalorder %s1652_s30, %s2140_s25 }
  0x56   : > { %p1655_p11 = pnand %p2498_p10, %p1653_p8  ;;  %p1660_p3 = por %p1659_p13, %p1658_p9 }
  0x58   : > { %p1656_p12 = pneg %p1655_p11  ;;  %p1662_p7 = por %p1661_p1, %p1660_p3 }
  0x5a   : > { %p1663_p4 = pnand %p1662_p7, %p1656_p12 }
  0x5c   : > { %1666 = shalt.err (!%p1663_p4)
}
  0x5d   : > { %s1667_s3 = scalar_lea.vmem %s2132_s5, 128  ;;  %s1905_s17 = smov [#allocation6]  }
  0x5e   : > { %p1668_p8 = scmp.ne.s32.totalorder %s2132_s5, %s1667_s3  ;;  %s1672_s28 = sshll.u32 %s1905_s17, 4  ;;  %s1673_s28 = int_to_ptr.vmem [resolvable:$false] %s1672_s28 }
  0x5f   : > { %s1674_s16 = scalar_lea.vmem %s1673_s28, 256  ;;  %p1675_p0 = scmp.lt.s32.totalorder %s2132_s5, %s1673_s28 }
  0x60   : > { %p1670_p11 = pnand %p1668_p8, %p2498_p10  ;;  %p1676_p13 = scmp.lt.s32.totalorder %s1674_s16, %s1667_s3 }
  0x62   : > { %p1671_p2 = pneg %p1670_p11  ;;  %p1677_p9 = por %p1676_p13, %p1675_p0 }
  0x64   : > { %p1678_p3 = pnand %p1677_p9, %p1671_p2 }
  0x66   : > { %1681 = shalt.err (!%p1678_p3)
}
  0x67   : > { %1485 = dma.hbm_to_vmem [thread:$0]  (!%p2125_p6), %s2140_s25, 128, %s2132_s5, %s2142_s23  }
  0x68   : > { %s2529_s30 = sshll.u32 %s2130_s8, 7  ;;  %s1906_s1 = smov [#allocation11]  }
  0x69   : > { %s2175_s17 = scalar_lea.hbm %s2470_s2, %s2529_s30  ;;  %s316_s28 = sshll.u32 %s1906_s1, 4  ;;  %s317_s28 = int_to_ptr.vmem [resolvable:$true] %s316_s28 }
  0x6a   : > { %s1682_s11 = scalar_lea.hbm %s2475_s7, 256  ;;  %p2530_p0 = pneg %p2039_p5 }
  0x6b   : > { %p1683_p7 = scmp.ne.s32.totalorder %s2475_s7, %s1682_s11  ;;  %p1689_p1 = scmp.lt.u32.totalorder %s1682_s11, %s2475_s7 }
  0x6d   : > { %p1685_p2 = pnand %p1683_p7, %p2530_p0 }
  0x6f   : > { %p1686_p4 = pneg %p1685_p2 }
  0x71   : > { %p1691_p12 = pnand %p1689_p1, %p1686_p4 }
  0x73   : > { %1694 = shalt.err (!%p1691_p12)
}
  0x74   : > { %s1695_s1 = scalar_lea.vmem %s317_s28, 256  ;;  %p2531_p11 = pmov %p2530_p0 }
  0x75   : > { %p1696_p8 = scmp.ne.s32.totalorder %s317_s28, %s1695_s1  ;;  %p1703_p3 = scmp.lt.s32.totalorder %s317_s28, %s317_s28 }
  0x76   : > { %p1704_p10 = scmp.lt.s32.totalorder %s1695_s1, %s1695_s1 }
  0x77   : > { %p1698_p13 = pnand %p1696_p8, %p2531_p11 }
  0x78   : > { %p1705_p6 = por %p1704_p10, %p1703_p3 }
  0x79   : > { %p1699_p9 = pneg %p1698_p13 }
  0x7b   : > { %p1706_p0 = pnand %p1705_p6, %p1699_p9 }
  0x7d   : > { %1709 = shalt.err (!%p1706_p0)
}
  0x7e   : > { %s2532_s15 = smov 4   ;;  %s2533_s29 = smov 64  }
  0x7f   : > { %1478 = dma.hbm_to_vmem [thread:$0]  (!%p2039_p5), %s2475_s7, 256, %s317_s28, [#allocation10], %s2533_s29, %s2533_s29, %s2532_s15  }
  0x80   : > { %s48_s24 = sadd.s32 1, %s1880_s14  ;;  %p55_p6 = scmp.ne.s32.totalorder %s1880_s14, %s1876_s13 }
  0x81   : > { %p2534_p10 = scmp.eq.s32.totalorder %s2103_s26, 0  ;;  %p2535_p7 = scmp.eq.s32.totalorder %s1900_s19, 0 }
  0x82   : > { %p61_p4 = scmp.ne.s32.totalorder %s1876_s13, %s1872_s12  ;;  %s333_s9 = sand.u32 1, %s1880_s14  }
  0x83   : > { %s2206_s30 = scalar_select %p2534_p10, %s1880_s14, %s48_s24  }
  0x84   : > { %p57_p2 = por %p2535_p7, %p55_p6  ;;  %s1318_s22 = sshll.u32 %s1896_s18, 7 }
  0x85   : > { %p2536_p1 = scmp.eq.s32.totalorder %s2026_s20, 0  ;;  %s1317_s16 = sshll.u32 %s333_s9, 3 }
  0x86   : > { %s2223_s28 = scalar_lea.hbm %s2468_s0, %s1318_s22  ;;  %p2538_p5 = scmp.lt.s32.totalorder %s1900_s19, 6 }
  0x87   : > { %p2216_p12 = por %p2536_p1, %p61_p4  ;;  %s337_s12 = scalar_lea.vmem [#allocation3], %s1317_s16 }
  0x88   : > { %p2227_p8 = pnand %p2538_p5, %p57_p2  ;;  %s344_s1 = sshll.u32 %s337_s12, 4  ;;  %s2234_s1 = int_to_ptr.vmem [resolvable:$true] %s344_s1 }
  0x89   : > { %s2537_s3 = scalar_select %p2216_p12, 1, 0 }
  0x8a   : > { %s375_s15 = scalar_lea.vmem [#allocation8], %s2117_s6  ;;  %s334_s11 = scalar_lea.sflag [#allocation4], %s333_s9 }
  0x8b   : > { %s2232_s29 = sshll.u32 %s375_s15, 4  ;;  %s1710_s25 = scalar_lea.hbm %s2223_s28, 128  ;;  %s385_s29 = int_to_ptr.vmem [resolvable:$true] %s2232_s29 }
  0x8c   : > { %p1711_p11 = scmp.ne.s32.totalorder %s2223_s28, %s1710_s25  ;;  %p1712_p13 = pneg %p2227_p8 }
  0x8d   : > { %s1715_s5 = scalar_lea.hbm %s2468_s0, 256  ;;  %p1716_p0 = scmp.lt.u32.totalorder %s2223_s28, %s2468_s0 }
  0x8e   : > { %p1713_p9 = pnand %p1712_p13, %p1711_p11  ;;  %p1717_p6 = scmp.lt.u32.totalorder %s1715_s5, %s1710_s25 }
  0x8f   : > { %p1719_p7 = scmp.lt.u32.totalorder %s1710_s25, %s2223_s28 }
  0x90   : > { %p1714_p3 = pneg %p1713_p9  ;;  %p1718_p10 = por %p1717_p6, %p1716_p0 }
  0x92   : > { %p1720_p2 = por %p1719_p7, %p1718_p10 }
  0x94   : > { %p1721_p4 = pnand %p1720_p2, %p1714_p3 }
  0x96   : > { %1724 = shalt.err (!%p1721_p4)
}
  0x97   : > { %s1725_s6 = scalar_lea.vmem %s2234_s1, 128  ;;  %s1907_s9 = smov [#allocation3]  }
  0x98   : > { %p1726_p1 = scmp.ne.s32.totalorder %s2234_s1, %s1725_s6  ;;  %s1730_s12 = sshll.u32 %s1907_s9, 4  ;;  %s1731_s12 = int_to_ptr.vmem [resolvable:$false] %s1730_s12 }
  0x99   : > { %s1732_s15 = scalar_lea.vmem %s1731_s12, 256  ;;  %p1733_p9 = scmp.lt.s32.totalorder %s2234_s1, %s1731_s12 }
  0x9a   : > { %p1728_p5 = pnand %p1726_p1, %p1712_p13  ;;  %p1734_p0 = scmp.lt.s32.totalorder %s1732_s15, %s1725_s6 }
  0x9c   : > { %p1729_p11 = pneg %p1728_p5  ;;  %p1735_p6 = por %p1734_p0, %p1733_p9 }
  0x9e   : > { %p1736_p10 = pnand %p1735_p6, %p1729_p11 }
  0xa0   : > { %1739 = shalt.err (!%p1736_p10)
}
  0xa1   : > { %1482 = dma.hbm_to_vmem [thread:$0]  (!%p2227_p8), %s2223_s28, 128, %s2234_s1, %s334_s11  }
  0xa2   : > { %s1740_s25 = scalar_lea.hbm %s2175_s17, 128  ;;  %p2540_p3 = scmp.ne.s32.totalorder %s2527_s4, 0 }
  0xa3   : > { %p1741_p13 = scmp.ne.s32.totalorder %s2175_s17, %s1740_s25  ;;  %s1745_s26 = scalar_lea.hbm %s2470_s2, 768 }
  0xa4   : > { %p2541_p7 = pneg %p2540_p3  ;;  %p1746_p1 = scmp.lt.u32.totalorder %s2175_s17, %s2470_s2 }
  0xa5   : > { %p1747_p5 = scmp.lt.u32.totalorder %s1745_s26, %s1740_s25  ;;  %p1749_p9 = scmp.lt.u32.totalorder %s1740_s25, %s2175_s17 }
  0xa6   : > { %p1743_p2 = pnand %p1741_p13, %p2541_p7 }
  0xa7   : > { %p1748_p11 = por %p1747_p5, %p1746_p1 }
  0xa8   : > { %p1744_p4 = pneg %p1743_p2 }
  0xa9   : > { %p1750_p0 = por %p1749_p9, %p1748_p11 }
  0xab   : > { %p1751_p8 = pnand %p1750_p0, %p1744_p4 }
  0xad   : > { %1754 = shalt.err (!%p1751_p8)
}
  0xae   : > { %s1755_s28 = scalar_lea.vmem %s385_s29, 128  ;;  %p2542_p10 = pmov %p2541_p7 }
  0xaf   : > { %p1756_p6 = scmp.ne.s32.totalorder %s385_s29, %s1755_s28  ;;  %s1908_s1 = smov [#allocation8]  }
  0xb0   : > { %s1760_s11 = sshll.u32 %s1908_s1, 4  ;;  %s1761_s11 = int_to_ptr.vmem [resolvable:$false] %s1760_s11 }
  0xb1   : > { %p1758_p13 = pnand %p1756_p6, %p2542_p10  ;;  %s1762_s8 = scalar_lea.vmem %s1761_s11, 256 }
  0xb2   : > { %p1763_p2 = scmp.lt.s32.totalorder %s385_s29, %s1761_s11  ;;  %p1764_p12 = scmp.lt.s32.totalorder %s1762_s8, %s1755_s28 }
  0xb3   : > { %p1759_p7 = pneg %p1758_p13 }
  0xb4   : > { %p1765_p1 = por %p1764_p12, %p1763_p2 }
  0xb6   : > { %p1766_p5 = pnand %p1765_p1, %p1759_p7 }
  0xb8   : > { %1769 = shalt.err (!%p1766_p5)
}
  0xb9   : > { %1488 = dma.hbm_to_vmem [thread:$0]  (!%p2540_p3), %s2175_s17, 128, %s385_s29, %s2142_s23  }
  0xba   : > { %p2543_p4 = scmp.ne.s32.totalorder %s2514_s21, 0 }
  0xbb   : > { %s395_s6 = sand.u32 (!%p2543_p4), 1, %s1876_s13   ;;  %p2544_p11 = scmp.ne.s32.totalorder (!%p2543_p4), %s2537_s3, 0 }
  0xbc   : > { %393 = sbr.rel (%p2543_p4) target bundleno = 1677 (0x68d), region = 56  ;;  %s1324_s9 = sshll.u32 (!%p2543_p4), %s395_s6, 3 }
  0xbd   : > { %s396_s12 = scalar_lea.sflag (!%p2543_p4), [#allocation4], %s395_s6  ;;  %s399_s15 = scalar_lea.vmem (!%p2543_p4), [#allocation3], %s1324_s9 }
  0xc3   : > { %1843 = dma.done.wait (%p2544_p11), %s396_s12, 128  }
  0xc4   : > { %1845 = vsyncadd (%p2544_p11), %s396_s12, 4294967168  ;;  %s404_s4 = sand.u32 1, %s2026_s20   ;;  %s406_s23 = sand.u32 1, %s1864_s10  }
  0xc5   : > { %s2293_s21 = sshll.u32 %s406_s23, 3  ;;  %s405_s17 = scalar_lea.sflag [#allocation7], %s404_s4 }
  0xc6   : > { %s408_s29 = scalar_lea.vmem [#allocation6], %s2293_s21  ;;  %p2545_p12 = scmp.ne.s32.totalorder %s2521_s27, 0 }
  0xc8   : > { %1847 = dma.done.wait (%p2545_p12), %s405_s17, 256  }
  0xc9   : > { %1849 = vsyncadd (%p2545_p12), %s405_s17, 4294967040  ;;  %s417_s3 = scalar_lea.vmem [#allocation8], %s2293_s21  ;;  %p2546_p3 = scmp.eq.s32.totalorder %s2026_s20, 0 }
  0xcb   : > { %1851 = dma.done.wait (%p2546_p3), [#allocation10], 512   ;;  %p2547_p9 = pmov %p2546_p3 }
  0xcc   : > { %s469_s25 = scalar_lea.vmem [#allocation12], %s2293_s21  ;;  %s2548_s24 = sld [smem:[#allocation19_spill]] }
  0xcd   : > { %1853 = vsyncadd (%p2547_p9), [#allocation10], 4294966784 }
  0xd2   : > { %p1330_p0 = scmp.ne.s32.totalorder %s2548_s24, 0 }
  0xd3   : > { %v1601_v0 = vld [vmem:[#allocation9] sm:$0xff] (!%p1330_p0)   ;;  %v1909_v1 = vmov (!%p1330_p0), 0.0   ;;  %v1602_v2 = vld [vmem:[#allocation9 + $0x8] sm:$0xff] (!%p1330_p0)   ;;  %vm1910_vm0 = vmmov (!%p1330_p0), 0   ;;  %v475_v3 = vld [vmem:[%s399_s15] sm:$0xff] (!%p1330_p0)  ;;  %vm500_vm1 = vcmask (!%p1330_p0), 261120  }
  0xd4   : > { %474 = sbr.rel (%p1330_p0) target bundleno = 437 (0x1b5), region = 80  ;;  %1381 = vmatprep.subr.bf16.mxu0 (!%p1330_p0), %v1909_v1  ;;  %1385 = vmatprep.mubr.msk.bf16.mxu0 (!%p1330_p0), %vm1910_vm0, %v1909_v1  ;;  %v476_v4 = vpack.c.bf16 (!%p1330_p0), %v475_v3, %v475_v3  ;;  %s2549_s22 = sld [smem:[#allocation29_spill]] (!%p1330_p0)  ;;  %vm545_vm2 = vcmask (!%p1330_p0), 257024  }
  0xd5   : > { %1382 = vmatpush3.bf16.msra.mxu0 (!%p1330_p0), %v1601_v0 }
  0xd6   : > { %1383 = vmatprep.subr.bf16.mxu0 (!%p1330_p0), %v1909_v1 }
  0xd9   : > { %1384 = vmatpush3.bf16.msra.mxu0 (!%p1330_p0), %v1602_v2 }
  0xda   : > { %v1331_v5 = vld [vmem:[%s2549_s22] ss:$0 sm:$0xff] (!%p1330_p0) }
  0xdc   : > { %1386 = vmatmul.mubr.msk.bf16.vlgmr.msra.gmra.mrb[0].mxu0 %vm500_vm1, %v476_v4 }
 0x1af   : > { %v538_v6 = vpop.f32.mrb[0].mxu0 }
 0x1b0   : > { %v539_v7 = vadd.f32 %v1331_v5, %v538_v6  ;;  %v1387_v8 = vpop.f32.mrb[1].mxu0 }
 0x1b1   : > { %v541_v9 = vpop.f32.mrb[2].mxu0 }
 0x1b2   : > { %v544_v10 = vpack.c.bf16 %v539_v7, %v539_v7  ;;  %v1388_v11 = vpop.f32.mrb[3].mxu0 }
 0x1b4   : > { %546 = vst.msk [vmem:[#allocation2] sm:$0xf] %vm545_vm2, %v544_v10 }
 0x1b5 PF: > { %s2550_s16 = sld [smem:[#allocation30_spill]]  ;;  %v1911_v13 = vmov 0.0   ;;  %vm1912_vm3 = vmmov 0   ;;  %v547_v15 = vld [vmem:[%s408_s29] sm:$0xff]  ;;  %vm572_vm4 = vcmask 261120   ;;  %s2552_s9 = sld [smem:[#allocation31_spill]] }
 0x1b6   : > { %1389 = vmatprep.subr.bf16.mxu0 %v1911_v13  ;;  %1397 = vmatprep.subr.bf16.mxu1 %v1911_v13  ;;  %v548_v16 = vpack.c.bf16 %v547_v15, %v547_v15  ;;  %vm687_vm5 = vcmask 64512   ;;  %s1913_s12 = smov 112   ;;  %s1914_s15 = smov 120   ;;  %v1606_v27 = vld [vmem:[#allocation11] sm:$0xff]   ;;  %v1607_v28 = vld [vmem:[#allocation11 + $0x8] sm:$0xff]   ;;  %vm749_vm6 = vcmask 1043456  }
 0x1b7   : > { %1393 = vmatprep.mubr.msk.bf16.mxu0 %vm1912_vm3, %v1911_v13  ;;  %1401 = vmatprep.mubr.msk.bf16.mxu1 %vm1912_vm3, %v1911_v13  ;;  %s1915_s4 = smov 104   ;;  %v617_v29 = vld [vmem:[%s417_s3] sm:$0xff]  ;;  %s2553_s3 = sld [smem:[#allocation32_spill]]  ;;  %vm1141_vm7 = vcmask 130048   ;;  %vm1143_vm8 = vcmask 195584  }
 0x1b8   : > { %1398 = vmatpush3.bf16.msra.mxu1 %v1606_v27  ;;  %v618_v30 = vpack.c.bf16 %v617_v29, %v617_v29  ;;  %s1916_s24 = smov 8   ;;  %s2554_s20 = sld [smem:[#allocation20_spill]] }
 0x1b9   : > { %1399 = vmatprep.subr.bf16.mxu1 %v1911_v13  ;;  %s2555_s27 = sld [smem:[#allocation19_spill]]  ;;  %s1917_s22 = smov 16  }
 0x1ba   : > { %s1918_s26 = smov 24   ;;  %s2556_s1 = sld [smem:[#allocation24_spill]] }
 0x1bb   : > { %s2551_s28 = smov %s2550_s16  ;;  %v1603_v12 = vld [vmem:[%s2550_s16] sm:$0xff]   ;;  %s1162_s8 = sshll.u32 %s469_s25, 4  ;;  %s2403_s8 = int_to_ptr.vmem [resolvable:$true] %s1162_s8 }
 0x1bc   : > { %1390 = vmatpush3.bf16.msra.mxu0 %v1603_v12  ;;  %v1604_v14 = vld [vmem:[%s2551_s28 + $0x8] sm:$0xff]   ;;  %v1335_v17 = vld [vmem:[%s2552_s9] ss:$0 sm:$0xff]  ;;  %1400 = vmatpush3.bf16.msra.mxu1 %v1607_v28  ;;  %s1147_s17 = scalar_lea.sflag [#allocation5], %s406_s23  ;;  %s1770_s29 = scalar_lea.vmem %s2403_s8, 128 }
 0x1bd   : > { %1391 = vmatprep.subr.bf16.mxu0 %v1911_v13  ;;  %v686_v22 = vld [vmem:[#allocation2] sm:$0xf]  ;;  %1411 = vmatprep.subr.bf16.mxu1 %v1911_v13  ;;  %p1771_p8 = scmp.ne.s32.totalorder %s2403_s8, %s1770_s29 }
 0x1be   : > { %v1345_v26 = vcombine.low %v686_v22, %v686_v22  ;;  %v1339_v45 = vld [vmem:[%s2553_s3] ss:$0 sm:$0xff]  ;;  %s1455_s5 = smul.u32 3, %s2554_s20  ;;  %s1919_s3 = smov [#allocation12]  }
 0x1bf   : > { %1402 = vmatmul.mubr.msk.bf16.vlgmr.msra.gmra.mrb[0].mxu1 %vm572_vm4, %v618_v30 }
 0x1c0   : > { %1392 = vmatpush3.bf16.msra.mxu0 %v1604_v14  ;;  %1413 = vmatprep.mubr.msk.bf16.mxu1 %vm1912_vm3, %v1911_v13  ;;  %s1158_s16 = sadd.s32 %s2555_s27, %s1455_s5  ;;  %p2559_p6 = scmp.ne.s32.totalorder %s2556_s1, 0 }
 0x1c1   : > { %1405 = vmatprep.subr.bf16.mxu0 %v1911_v13  ;;  %s1353_s11 = sshll.u32 %s1158_s16, 7 }
 0x1c2   : > { %p1772_p10 = pnand %p1771_p8, %p2559_p6 }
 0x1c3   : > { %1394 = vmatmul.mubr.msk.bf16.vlgmr.msra.gmra.mrb[0].mxu0 %vm572_vm4, %v548_v16 }
 0x1c4   : > { %1407 = vmatprep.mubr.msk.bf16.mxu0 %vm1912_vm3, %v1911_v13  ;;  %p1773_p13 = pneg %p1772_p10 }
 0x292   : > { %v679_v46 = vpop.f32.mrb[0].mxu1 }
 0x293   : > { %v680_v47 = vadd.f32 %v1339_v45, %v679_v46  ;;  %v1403_v48 = vpop.f32.mrb[1].mxu1 }
 0x294   : > { %v682_v49 = vpop.f32.mrb[2].mxu1 }
 0x295   : > { %v685_v50 = vpack.c.bf16 %v680_v47, %v680_v47  ;;  %v1404_v51 = vpop.f32.mrb[3].mxu1 }
 0x296   : > { %v610_v18 = vpop.f32.mrb[0].mxu0 }
 0x297   : > { %v611_v19 = vadd.f32 %v1335_v17, %v610_v18  ;;  %v1395_v20 = vpop.f32.mrb[1].mxu0  ;;  %v751_v52 = vsel %vm749_vm6, %v685_v50, 0 }
 0x298   : > { %v613_v21 = vpop.f32.mrb[2].mxu0  ;;  %1412 = vmatpush3.bf16.msra.mxu1 %v751_v52 }
 0x299   : > { %v616_v23 = vpack.c.bf16 %v611_v19, %v611_v19  ;;  %v1396_v24 = vpop.f32.mrb[3].mxu0  ;;  %1423 = vmatprep.subr.bf16.mxu1 %v1911_v13 }
 0x29b   : > { %910 = vrot.lane.b32.xlu1 %v616_v23, %s1913_s12  ;;  %799 = vrot.lane.b32.xlu0 %v616_v23, %s1914_s15  ;;  %v692_v25 = vsel %vm687_vm5, %v616_v23, 0 }
 0x29c   : > { %1406 = vmatpush3.bf16.xpose.msra.mxu0 %v692_v25 }
 0x29d   : > { %1417 = vmatprep.subr.bf16.mxu0 %v1911_v13 }
 0x29f   : > { %796 = vrot.lane.b32.xlu0 %v1345_v26, %s1914_s15  ;;  %908 = vrot.lane.b32.xlu1 %v1345_v26, %s1913_s12 }
 0x2a3   : > { %1020 = vrot.lane.b32.xlu0 %v616_v23, %s1915_s4  ;;  %1408 = vmatmul.mubr.msk.bf16.vlgmr.msra.gmra.mrb[4].mxu0 %vm687_vm5, %v686_v22 }
 0x2a4   : > { %1018 = vrot.lane.b32.xlu1 %v1345_v26, %s1915_s4  ;;  %1419 = vmatprep.mubr.msk.bf16.mxu0 %vm1912_vm3, %v1911_v13 }
 0x30d   : > { %v800_v31 = vpop.permute.xlu0 %799  ;;  %v911_v33 = vpop.permute.xlu1 %910 }
 0x30e   : > { %v805_v32 = vsel %vm687_vm5, %v800_v31, 0  ;;  %v916_v35 = vsel %vm687_vm5, %v911_v33, 0 }
 0x30f   : > { %1418 = vmatpush3.bf16.xpose.msra.mxu0 %v805_v32 }
 0x310   : > { %1429 = vmatprep.subr.bf16.mxu0 %v1911_v13 }
 0x311   : > { %v797_v34 = vpop.permute.xlu0 %796  ;;  %v909_v37 = vpop.permute.xlu1 %908 }
 0x315   : > { %v1021_v36 = vpop.permute.xlu0 %1020 }
 0x316   : > { %1420 = vmatmul.mubr.msk.bf16.vlgmr.msra.gmra.mrb[8].mxu0 %vm687_vm5, %v797_v34  ;;  %v1026_v38 = vsel %vm687_vm5, %v1021_v36, 0  ;;  %v1019_v39 = vpop.permute.xlu1 %1018 }
 0x317   : > { %1430 = vmatpush3.bf16.xpose.msra.mxu0 %v916_v35  ;;  %1431 = vmatprep.mubr.msk.bf16.mxu0 %vm1912_vm3, %v1911_v13 }
 0x318   : > { %1441 = vmatprep.subr.bf16.mxu0 %v1911_v13 }
 0x31e   : > { %1432 = vmatmul.mubr.msk.bf16.vlgmr.msra.gmra.mrb[12].mxu0 %vm687_vm5, %v909_v37 }
 0x31f   : > { %1442 = vmatpush3.bf16.xpose.msra.mxu0 %v1026_v38  ;;  %1443 = vmatprep.mubr.msk.bf16.mxu0 %vm1912_vm3, %v1911_v13 }
 0x326   : > { %1444 = vmatmul.mubr.msk.bf16.vlgmr.msra.gmra.mrb[16].mxu0 %vm687_vm5, %v1019_v39 }
 0x376   : > { %v728_v40 = vpop.f32.mrb[4].mxu0 }
 0x377   : > { %v734_v41 = vsel %vm687_vm5, %v728_v40, -inf  ;;  %v1409_v42 = vpop.f32.mrb[5].mxu0 }
 0x378   : > { %735 = vmax.xlane.f32.xlu0 %v734_v41  ;;  %v731_v43 = vpop.f32.mrb[6].mxu0 }
 0x379   : > { %v1410_v44 = vpop.f32.mrb[7].mxu0 }
 0x3e9   : > { %v841_v53 = vpop.f32.mrb[8].mxu0 }
 0x3ea   : > { %v1421_v54 = vpop.f32.mrb[9].mxu0  ;;  %v847_v55 = vsel %vm687_vm5, %v841_v53, -inf }
 0x3eb   : > { %848 = vmax.xlane.f32.xlu1 %v847_v55  ;;  %v844_v56 = vpop.f32.mrb[10].mxu0 }
 0x3ec   : > { %v1422_v57 = vpop.f32.mrb[11].mxu0 }
 0x3f1   : > { %v952_v58 = vpop.f32.mrb[12].mxu0 }
 0x3f2   : > { %v1433_v59 = vpop.f32.mrb[13].mxu0  ;;  %v958_v60 = vsel %vm687_vm5, %v952_v58, -inf }
 0x3f3   : > { %959 = vmax.xlane.f32.xlu0 %v958_v60  ;;  %v955_v61 = vpop.f32.mrb[14].mxu0 }
 0x3f4   : > { %v1434_v62 = vpop.f32.mrb[15].mxu0 }
 0x3f9   : > { %v1062_v63 = vpop.f32.mrb[16].mxu0 }
 0x3fa   : > { %v1445_v0 = vpop.f32.mrb[17].mxu0  ;;  %v1068_v1 = vsel %vm687_vm5, %v1062_v63, -inf }
 0x3fb   : > { %1069 = vmax.xlane.f32.xlu0 %v1068_v1  ;;  %v1065_v2 = vpop.f32.mrb[18].mxu0 }
 0x3fc   : > { %v1446_v3 = vpop.f32.mrb[19].mxu0 }
 0x405   : > { %v736_v4 = vpop.xlane.xlu0 %735 }
 0x406   : > { %v737_v5 = vsub.f32 %v728_v40, %v736_v4 }
 0x408   : > { %v738_v6 = vmul.f32 1.442695, %v737_v5 }
 0x40a   : > { %1608 = vpow2.f32 %v738_v6 }
 0x414   : > { %v1609_v7 = vpop.eup %1608 }
 0x415   : > { %v740_v8 = vsel %vm687_vm5, %v1609_v7, 0.0 }
 0x416   : > { %741 = vadd.xlane.f32.xlu1 %v740_v8 }
 0x427   : > { %860 = vrot.lane.b32.xlu1 %v685_v50, %s1914_s15 }
 0x478   : > { %v849_v9 = vpop.xlane.xlu1 %848 }
 0x479   : > { %v850_v10 = vsub.f32 %v841_v53, %v849_v9 }
 0x47b   : > { %v851_v11 = vmul.f32 1.442695, %v850_v10 }
 0x47d   : > { %1610 = vpow2.f32 %v851_v11 }
 0x480   : > { %v960_v12 = vpop.xlane.xlu0 %959 }
 0x481   : > { %v961_v14 = vsub.f32 %v952_v58, %v960_v12 }
 0x483   : > { %v962_v15 = vmul.f32 1.442695, %v961_v14 }
 0x485   : > { %1612 = vpow2.f32 %v962_v15 }
 0x487   : > { %v1611_v16 = vpop.eup %1610 }
 0x488   : > { %v1070_v17 = vpop.xlane.xlu0 %1069  ;;  %v853_v18 = vsel %vm687_vm5, %v1611_v16, 0.0 }
 0x489   : > { %v1071_v19 = vsub.f32 %v1062_v63, %v1070_v17  ;;  %854 = vadd.xlane.f32.xlu0 %v853_v18 }
 0x48b   : > { %v1072_v20 = vmul.f32 1.442695, %v1071_v19 }
 0x48d   : > { %1614 = vpow2.f32 %v1072_v20 }
 0x48f   : > { %v1613_v21 = vpop.eup %1612 }
 0x490   : > { %v964_v22 = vsel %vm687_vm5, %v1613_v21, 0.0 }
 0x491   : > { %965 = vadd.xlane.f32.xlu1 %v964_v22 }
 0x497   : > { %v1615_v23 = vpop.eup %1614 }
 0x498   : > { %v1074_v24 = vsel %vm687_vm5, %v1615_v23, 0.0 }
 0x499   : > { %1075 = vadd.xlane.f32.xlu0 %v1074_v24 }
 0x4a2   : > { %1080 = vrot.lane.b32.xlu1 %v685_v50, %s1915_s4 }
 0x4a3   : > { %v742_v25 = vpop.xlane.xlu1 %741 }
 0x4a4   : > { %1616 = vrcp.f32 %v742_v25 }
 0x4a7   : > { %v861_v27 = vpop.permute.xlu1 %860 }
 0x4a8   : > { %v866_v30 = vsel %vm749_vm6, %v861_v27, 0 }
 0x4ae   : > { %v1617_v26 = vpop.eup %1616 }
 0x4af   : > { %v744_v28 = vmul.f32 %v1617_v26, %v1609_v7  ;;  %970 = vrot.lane.b32.xlu0 %v685_v50, %s1913_s12  ;;  %s2557_s12 = sld [smem:[#allocation33_spill]] }
 0x4b1   : > { %v745_v29 = vpack.c.bf16 %v744_v28, %v744_v28 }
 0x4b3   : > { %1414 = vmatmul.mubr.msk.bf16.vlgmr.msra.gmra.mrb[4].mxu1 %vm687_vm5, %v745_v29 }
 0x4b4   : > { %1424 = vmatpush3.bf16.msra.mxu1 %v866_v30  ;;  %1425 = vmatprep.mubr.msk.bf16.mxu1 %vm1912_vm3, %v1911_v13 }
 0x4b5   : > { %1435 = vmatprep.subr.bf16.mxu1 %v1911_v13  ;;  %s2558_s4 = smov %s2557_s12  ;;  %s2401_s15 = scalar_lea.hbm %s2557_s12, %s1353_s11 }
 0x516   : > { %v855_v31 = vpop.xlane.xlu0 %854 }
 0x517   : > { %1618 = vrcp.f32 %v855_v31 }
 0x51e   : > { %v966_v32 = vpop.xlane.xlu1 %965 }
 0x51f   : > { %1620 = vrcp.f32 %v966_v32 }
 0x521   : > { %v1619_v33 = vpop.eup %1618 }
 0x522   : > { %v857_v34 = vmul.f32 %v1619_v33, %v1611_v16  ;;  %v1081_v41 = vpop.permute.xlu1 %1080 }
 0x523   : > { %v1086_v43 = vsel %vm749_vm6, %v1081_v41, 0 }
 0x524   : > { %v858_v35 = vpack.c.bf16 %v857_v34, %v857_v34 }
 0x526   : > { %1426 = vmatmul.mubr.msk.bf16.vlgmr.msra.gmra.mrb[8].mxu1 %vm687_vm5, %v858_v35  ;;  %v1076_v36 = vpop.xlane.xlu0 %1075 }
 0x527   : > { %1622 = vrcp.f32 %v1076_v36  ;;  %1437 = vmatprep.mubr.msk.bf16.mxu1 %vm1912_vm3, %v1911_v13 }
 0x529   : > { %v1621_v37 = vpop.eup %1620 }
 0x52a   : > { %v968_v38 = vmul.f32 %v1621_v37, %v1613_v21  ;;  %v971_v39 = vpop.permute.xlu0 %970 }
 0x52b   : > { %v976_v40 = vsel %vm749_vm6, %v971_v39, 0 }
 0x52c   : > { %1436 = vmatpush3.bf16.msra.mxu1 %v976_v40  ;;  %v969_v42 = vpack.c.bf16 %v968_v38, %v968_v38 }
 0x52d   : > { %1447 = vmatprep.subr.bf16.mxu1 %v1911_v13 }
 0x52f   : > { %1438 = vmatmul.mubr.msk.bf16.vlgmr.msra.gmra.mrb[12].mxu1 %vm687_vm5, %v969_v42 }
 0x530   : > { %1448 = vmatpush3.bf16.msra.mxu1 %v1086_v43  ;;  %1449 = vmatprep.mubr.msk.bf16.mxu1 %vm1912_vm3, %v1911_v13 }
 0x531   : > { %v1623_v44 = vpop.eup %1622 }
 0x532   : > { %v1078_v45 = vmul.f32 %v1623_v44, %v1615_v23 }
 0x534   : > { %v1079_v46 = vpack.c.bf16 %v1078_v45, %v1078_v45 }
 0x537   : > { %1450 = vmatmul.mubr.msk.bf16.vlgmr.msra.gmra.mrb[16].mxu1 %vm687_vm5, %v1079_v46 }
 0x586   : > { %v787_v47 = vpop.f32.mrb[4].mxu1 }
 0x587   : > { %v1415_v48 = vpop.f32.mrb[5].mxu1 }
 0x588   : > { %v790_v49 = vpop.f32.mrb[6].mxu1 }
 0x589   : > { %v1416_v50 = vpop.f32.mrb[7].mxu1 }
 0x5f9   : > { %v902_v51 = vpop.f32.mrb[8].mxu1 }
 0x5fa   : > { %1129 = vrot.lane.b32.xlu1 %v902_v51, %s1916_s24  ;;  %v1427_v52 = vpop.f32.mrb[9].mxu1  ;;  %s1774_s24 = sshll.u32 %s1919_s3, 4  ;;  %s1775_s24 = int_to_ptr.vmem [resolvable:$false] %s1774_s24 }
 0x5fb   : > { %v905_v53 = vpop.f32.mrb[10].mxu1  ;;  %s1776_s20 = scalar_lea.vmem %s1775_s24, 256  ;;  %p1777_p7 = scmp.lt.s32.totalorder %s2403_s8, %s1775_s24 }
 0x5fc   : > { %v1428_v54 = vpop.f32.mrb[11].mxu1  ;;  %p1778_p2 = scmp.lt.s32.totalorder %s1776_s20, %s1770_s29 }
 0x5fe   : > { %p1779_p1 = por %p1778_p2, %p1777_p7 }
 0x600   : > { %p1780_p5 = pnand %p1779_p1, %p1773_p13 }
 0x602   : > { %v1012_v55 = vpop.f32.mrb[12].mxu1 }
 0x603   : > { %1133 = vrot.lane.b32.xlu0 %v1012_v55, %s1917_s22  ;;  %v1439_v13 = vpop.f32.mrb[13].mxu1 }
 0x604   : > { %v1015_v56 = vpop.f32.mrb[14].mxu1 }
 0x605   : > { %v1440_v57 = vpop.f32.mrb[15].mxu1 }
 0x60a   : > { %v1122_v58 = vpop.f32.mrb[16].mxu1 }
 0x60b   : > { %1137 = vrot.lane.b32.xlu1 %v1122_v58, %s1918_s26  ;;  %v1451_v59 = vpop.f32.mrb[17].mxu1 }
 0x60c   : > { %v1125_v60 = vpop.f32.mrb[18].mxu1 }
 0x60d   : > { %v1452_v61 = vpop.f32.mrb[19].mxu1 }
 0x66c   : > { %v1130_v62 = vpop.permute.xlu1 %1129 }
 0x66d   : > { %v1140_v0 = vsel %vm687_vm5, %v787_v47, %v1130_v62 }
 0x675   : > { %v1134_v63 = vpop.permute.xlu0 %1133 }
 0x676   : > { %v1142_v1 = vsel %vm1141_vm7, %v1140_v0, %v1134_v63 }
 0x67d   : > { %v1138_v2 = vpop.permute.xlu1 %1137 }
 0x67e   : > { %v1144_v3 = vsel %vm1143_vm8, %v1142_v1, %v1138_v2 }
 0x67f   : > { %1145 = vst.msk [vmem:[%s469_s25] sm:$0xff] %vm572_vm4, %v1144_v3 }
 0x680   : > { %1783 = shalt.err (!%p1780_p5)
}
 0x681   : > { %s1784_s23 = scalar_lea.hbm %s2401_s15, 128  ;;  %s1788_s27 = scalar_lea.hbm %s2558_s4, 768 }
 0x682   : > { %p1785_p4 = scmp.ne.s32.totalorder %s2401_s15, %s1784_s23  ;;  %p1789_p3 = scmp.lt.u32.totalorder %s2401_s15, %s2558_s4 }
 0x683   : > { %p1790_p9 = scmp.lt.u32.totalorder %s1788_s27, %s1784_s23  ;;  %p1792_p8 = scmp.lt.u32.totalorder %s1784_s23, %s2401_s15 }
 0x684   : > { %p1786_p11 = pnand %p1785_p4, %p2559_p6 }
 0x685   : > { %p1791_p0 = por %p1790_p9, %p1789_p3 }
 0x686   : > { %p1787_p12 = pneg %p1786_p11 }
 0x687   : > { %p1793_p10 = por %p1792_p8, %p1791_p0 }
 0x689   : > { %p1794_p13 = pnand %p1793_p10, %p1787_p12 }
 0x68b   : > { %1797 = shalt.err (!%p1794_p13)
}
 0x68c   : > { %1470 = dma.vmem_to_hbm [thread:$0]  (%p2559_p6), %s2403_s8, 128, %s2401_s15, %s1147_s17  }
 0x68d PF: > { %s2560_s5 = sld [smem:[#allocation17_spill]]  ;;  %s2561_s16 = sld [smem:[#allocation25_spill]] }
 0x68e   : > { %p1498_p7 = scmp.ge.s32.totalorder %s1900_s19, 2 }
 0x693   : > { %s1174_s11 = sand.u32 1, %s2560_s5   ;;  %p2562_p2 = scmp.ne.s32.totalorder %s2561_s16, 0 }
 0x694   : > { %s1175_s6 = scalar_lea.sflag [#allocation5], %s1174_s11 }
 0x695   : > { %p1490_p1 = pnand %p1498_p7, %p2562_p2 }
 0x697   : > { %1855 = dma.done.wait (!%p1490_p1), %s1175_s6, 128  }
 0x698   : > { %1857 = vsyncadd (!%p1490_p1), %s1175_s6, 4294967168  ;;  %s29_s19 = sadd.s32 1, %s1900_s19   ;;  %s2563_s9 = sld [smem:[#allocation18_spill]] }
 0x699   : > { %p26_p5 = scmp.ge.s32.totalorder %s29_s19, 8   ;;  %s2564_s11 = sld [smem:[#allocation26_spill]] }
 0x69a   : > { %s2565_s1 = smov %s2206_s30  ;;  %s2566_s15 = sld [smem:[#allocation21_spill]] }
 0x69b   : > { %s2567_s17 = sld [smem:[#allocation22_spill]]  ;;  %s2568_s8 = sld [smem:[#allocation23_spill]] }
 0x69c   : > { %s2569_s30 = smov %s1864_s10  ;;  %s2571_s12 = smov %s1876_s13 }
 0x69d   : > { %s2572_s13 = smov %s1880_s14  ;;  %s2573_s14 = smov %s2565_s1 }
 0x69e   : > { %s2570_s10 = smov %s2563_s9  ;;  %s2574_s16 = smov %s1896_s18 }
 0x69f   :  { %28 = sbr.rel (!%p26_p5) target bundleno = 20 (0x14), region = 137 }
 0x6a1   : > { %s2575_s18 = smov %s2568_s8 }
 0x6a6   :  { %1180 = vsyncpa [#allocation4], 1 }
 0x6a7   :  { %1182 = vsyncpa [#allocation4 + $0x1], 1 }
 0x6a8   :  { %1183 = vsyncpa [#allocation7], 1 }
 0x6a9   :  { %1185 = vsyncpa [#allocation7 + $0x1], 1 }
 0x6aa   :  { %1186 = vsyncpa [#allocation10], 1 }
 0x6ab   :  { %1187 = vsyncpa [#allocation5], 1 }
 0x6ac   :  { %1189 = vsyncpa [#allocation5 + $0x1], 1 }

</bundles_post_ra>
